<compile_context>
chip_gen: v6e
topology: v6e:2x2x1
jax: 0.10.0
libtpu: 0.0.40
codegen_flags: <defaults>
</compile_context>

<pallas_src>
import numpy as np
import jax
import jax.numpy as jnp
from jax.experimental import pallas as pl
from jax.experimental.pallas import tpu as pltpu

LN_EPS = 1e-5  # torch.nn.LayerNorm default eps


def _round_up(x, m):
    return ((x + m - 1) // m) * m


def relation_classifier_kernel(x_ref, w1_ref, b1_ref, gw_ref, sgw_ref, c_ref, o_ref):
    # x_ref : (Bt, 2D)   w1_ref : (2D, D)   gw_ref : (1, D)   sgw/c : (1, 1)
    # Linear(2D -> D) + ReLU, f32 accumulation on the MXU.
    h = jnp.dot(x_ref[...], w1_ref[...], preferred_element_type=jnp.float32)
    h = jnp.maximum(h + b1_ref[...], 0.0)

    # One-pass LayerNorm statistics (biased variance, eps inside the rsqrt,
    # exactly like torch.nn.LayerNorm).  var = E[h^2] - mean^2.
    inv_d = 1.0 / h.shape[-1]
    mean = jnp.sum(h, axis=-1, keepdims=True) * inv_d
    ex2 = jnp.sum(h * h, axis=-1, keepdims=True) * inv_d
    var = jnp.maximum(ex2 - mean * mean, 0.0)          # guard fp cancellation
    rstd = jax.lax.rsqrt(var + LN_EPS)                 # EUP slot

    # Fused LayerNorm-affine + Linear(D -> 1):
    #   z = rstd * (h . (gamma*w2) - mean * sum(gamma*w2)) + (beta . w2 + b2)
    dot_gw = jnp.sum(h * gw_ref[...], axis=-1, keepdims=True)
    z = rstd * (dot_gw - mean * sgw_ref[...]) + c_ref[...]

    o_ref[...] = jax.nn.sigmoid(z).astype(o_ref.dtype)


def _pick_row_tile(n_rows, block_rows, mult):
    """Row tile: multiple of `mult`, >=2 grid steps when possible, and a
    multiple of 128 once large enough (dense sublane/lane usage)."""
    half = -(-max(n_rows, 1) // 2)                     # ceil(n_rows / 2)
    bt = min(block_rows, _round_up(half, mult))
    if bt >= 128:
        bt = (bt // 128) * 128                         # lane/MXU friendly
    return max(_round_up(bt, mult), mult)


def relation_classifier(x, params, *, block_rows=512, use_bf16_matmul=False):
    """x: (..., 2*d_model) float32 -> (..., 1) float32."""
    lead = x.shape[:-1]
    din = x.shape[-1]
    d = params["w1"].shape[1]
    assert din == params["w1"].shape[0] == 2 * d

    # Flatten leading dims into one row axis and tile it.
    x2 = x.reshape(-1, din).astype(jnp.float32)
    n_rows = x2.shape[0]
    mult = 16 if use_bf16_matmul else 8                # bf16 sublane packing
    bt = _pick_row_tile(n_rows, block_rows, mult)
    n_pad = _round_up(max(n_rows, 1), bt)
    if n_pad != n_rows:
        x2 = jnp.pad(x2, ((0, n_pad - n_rows), (0, 0)))

    w1 = params["w1"].astype(jnp.float32)
    b1 = params["b1"].reshape(1, d).astype(jnp.float32)
    gamma = params["gamma"].reshape(1, d).astype(jnp.float32)
    beta = params["beta"].reshape(1, d).astype(jnp.float32)
    w2_row = params["w2"].reshape(1, d).astype(jnp.float32)
    b2 = params["b2"].reshape(1, 1).astype(jnp.float32)

    # Fold LayerNorm-affine + Linear(D->1) into per-feature weights + constants.
    gw = gamma * w2_row                                # (1, d)
    sgw = jnp.sum(gw, keepdims=True)                   # (1, 1)
    c = jnp.sum(beta * w2_row, keepdims=True) + b2     # (1, 1)

    if use_bf16_matmul:
        # Cast in the wrapper so x is STREAMED from HBM as bf16 (halves the
        # dominant DMA traffic); accumulation stays f32 on the MXU.
        x2 = x2.astype(jnp.bfloat16)
        w1 = w1.astype(jnp.bfloat16)

    # Explicit scoped-VMEM budget: double-buffered x tile + output + weights.
    in_bytes = x2.dtype.itemsize
    w_bytes = w1.dtype.itemsize
    vmem_needed = (2 * bt * din * in_bytes             # x tile (double-buffered)
                   + 2 * bt * 4                        # output tile
                   + 2 * (din * d * w_bytes + 3 * d * 4 + 2 * 4))  # weights
    vmem_limit = int(min(max(vmem_needed + (4 << 20), 32 << 20), 128 << 20))

    def const_spec(shape):                             # resident weight blocks
        return pl.BlockSpec(shape, lambda i: (0, 0))

    out = pl.pallas_call(
        relation_classifier_kernel,
        out_shape=jax.ShapeDtypeStruct((n_pad, 1), jnp.float32),
        grid_spec=pltpu.PrefetchScalarGridSpec(
            num_scalar_prefetch=0,
            grid=(n_pad // bt,),
            in_specs=[
                pl.BlockSpec((bt, din), lambda i: (i, 0)),  # x rows per step
                const_spec((din, d)),                       # w1
                const_spec((1, d)),                         # b1
                const_spec((1, d)),                         # gw = gamma*w2
                const_spec((1, 1)),                         # sum(gw)
                const_spec((1, 1)),                         # beta.w2 + b2
            ],
            out_specs=pl.BlockSpec((bt, 1), lambda i: (i, 0)),
        ),
        compiler_params=pltpu.CompilerParams(
            dimension_semantics=("parallel",),
            vmem_limit_bytes=vmem_limit,
        ),
    )(x2, w1, b1, gw, sgw, c)

    return out[:n_rows].reshape(*lead, 1)


# ------------------- deterministic parameter construction -------------------
def make_params(key, d_model):
    k1, k2, k3, k4, k5, k6 = jax.random.split(key, 6)
    s1 = 1.0 / np.sqrt(2 * d_model)
    s2 = 1.0 / np.sqrt(d_model)
    return {
        "w1": jax.random.uniform(k1, (2 * d_model, d_model), jnp.float32, -s1, s1),
        "b1": jax.random.uniform(k2, (1, d_model), jnp.float32, -s1, s1),
        # Non-trivial LN affine params so the fused gw/sgw/c path is exercised.
        "gamma": 1.0 + 0.1 * jax.random.normal(k5, (1, d_model), jnp.float32),
        "beta": 0.1 * jax.random.normal(k6, (1, d_model), jnp.float32),
        "w2": jax.random.uniform(k3, (d_model, 1), jnp.float32, -s2, s2),
        "b2": jax.random.uniform(k4, (1, 1), jnp.float32, -s2, s2),
    }


# ------------------- pure-JAX reference (sanity check) -------------------
def ref_forward(x, p):
    h = jnp.maximum(x @ p["w1"] + p["b1"], 0.0)
    mean = h.mean(-1, keepdims=True)
    var = jnp.square(h - mean).mean(-1, keepdims=True)
    hn = (h - mean) / jnp.sqrt(var + LN_EPS) * p["gamma"] + p["beta"]
    return jax.nn.sigmoid(hn @ p["w2"] + p["b2"])


if __name__ == "__main__":
    key = jax.random.PRNGKey(0)

    # ---- test 1: small batch; exercises row padding and a 2-step grid ----
    B1, D1 = 10, 32                        # input feature dim = 64
    k1, k2, key = jax.random.split(key, 3)
    x1 = jax.random.normal(k1, (B1, 2 * D1), jnp.float32)
    p1 = make_params(k2, D1)
    out1 = jax.block_until_ready(relation_classifier(x1, p1, block_rows=8))
    with jax.default_matmul_precision("highest"):
        ref1 = jax.block_until_ready(ref_forward(x1, p1))
    assert out1.shape == (B1, 1)
    assert np.allclose(np.asarray(out1), np.asarray(ref1), rtol=1e-2, atol=1e-2)

    # ---- test 2: default tiling (f32) and the bf16-streaming variant ----
    B2, D2 = 40, 64                        # input feature dim = 128
    k3, k4, key = jax.random.split(key, 3)
    x2 = jax.random.normal(k3, (B2, 2 * D2), jnp.float32)
    p2 = make_params(k4, D2)
    with jax.default_matmul_precision("highest"):
        ref2 = jax.block_until_ready(ref_forward(x2, p2))

    out2 = jax.block_until_ready(relation_classifier(x2, p2))
    assert out2.shape == (B2, 1)
    assert np.allclose(np.asarray(out2), np.asarray(ref2), rtol=1e-2, atol=1e-2)

    # bf16 MXU operands + bf16 x streaming (intentional approximation).
    out2b = jax.block_until_ready(
        relation_classifier(x2, p2, use_bf16_matmul=True))
    assert out2b.shape == (B2, 1)
    assert np.allclose(np.asarray(out2b), np.asarray(ref2), rtol=5e-2, atol=5e-2)

    print("KERNEL_OK")
</pallas_src>

<mosaic_0001>
module attributes {stable_mosaic.version = 11 : i64} {
  func.func @relation_classifier_kernel(%arg0: i32, %arg1: memref<8x64xf32, #tpu.memory_space<vmem>>, %arg2: memref<64x32xf32, #tpu.memory_space<vmem>>, %arg3: memref<1x32xf32, #tpu.memory_space<vmem>>, %arg4: memref<1x32xf32, #tpu.memory_space<vmem>>, %arg5: memref<1x1xf32, #tpu.memory_space<vmem>>, %arg6: memref<1x1xf32, #tpu.memory_space<vmem>>, %arg7: memref<8x1xf32, #tpu.memory_space<vmem>>) attributes {dimension_semantics = [#tpu.dimension_semantics<parallel>], iteration_bounds = array<i64: 2>, scalar_prefetch = 0 : i64, scratch_operands = 0 : i64, tpu.core_type = #tpu.core_type<tc>, window_params = [{transform_indices = @transform_0, window_bounds = array<i64: 8, 64>}, {pipeline_mode = #tpu.pipeline_mode<synchronous>, transform_indices = @transform_1, window_bounds = array<i64: 64, 32>}, {pipeline_mode = #tpu.pipeline_mode<synchronous>, transform_indices = @transform_2, window_bounds = array<i64: 1, 32>}, {pipeline_mode = #tpu.pipeline_mode<synchronous>, transform_indices = @transform_3, window_bounds = array<i64: 1, 32>}, {pipeline_mode = #tpu.pipeline_mode<synchronous>, transform_indices = @transform_4, window_bounds = array<i64: 1, 1>}, {pipeline_mode = #tpu.pipeline_mode<synchronous>, transform_indices = @transform_5, window_bounds = array<i64: 1, 1>}, {transform_indices = @transform_6, window_bounds = array<i64: 8, 1>}]} {
    %c0 = arith.constant 0 : index
    %c0_0 = arith.constant 0 : index
    %0 = vector.load %arg1[%c0, %c0_0] : memref<8x64xf32, #tpu.memory_space<vmem>>, vector<8x64xf32>
    %c0_1 = arith.constant 0 : index
    %c0_2 = arith.constant 0 : index
    %1 = vector.load %arg2[%c0_1, %c0_2] : memref<64x32xf32, #tpu.memory_space<vmem>>, vector<64x32xf32>
    %cst = arith.constant dense<0.000000e+00> : vector<8x32xf32>
    %2 = tpu.matmul %0, %1, %cst {dimension_numbers = #tpu.dot_dimension_numbers<[1], [0], [0], [1], [0, 0, 1, 1], [], []>} : vector<8x64xf32>, vector<64x32xf32>, vector<8x32xf32> -> vector<8x32xf32>
    %c0_3 = arith.constant 0 : index
    %c0_4 = arith.constant 0 : index
    %3 = vector.load %arg3[%c0_3, %c0_4] : memref<1x32xf32, #tpu.memory_space<vmem>>, vector<1x32xf32>
    %4 = vector.broadcast %3 : vector<1x32xf32> to vector<8x32xf32>
    %5 = arith.addf %2, %4 : vector<8x32xf32>
    %cst_5 = arith.constant 0.000000e+00 : f32
    %6 = vector.broadcast %cst_5 : f32 to vector<8x32xf32>
    %7 = arith.maximumf %5, %6 : vector<8x32xf32>
    %cst_6 = arith.constant dense<0.000000e+00> : vector<8xf32>
    %8 = vector.multi_reduction <add>, %7, %cst_6 [1] : vector<8x32xf32> to vector<8xf32>
    %9 = vector.shape_cast %8 : vector<8xf32> to vector<8x1xf32>
    %cst_7 = arith.constant 3.125000e-02 : f32
    %10 = vector.broadcast %cst_7 : f32 to vector<8x1xf32>
    %11 = arith.mulf %9, %10 : vector<8x1xf32>
    %12 = arith.mulf %7, %7 : vector<8x32xf32>
    %cst_8 = arith.constant dense<0.000000e+00> : vector<8xf32>
    %13 = vector.multi_reduction <add>, %12, %cst_8 [1] : vector<8x32xf32> to vector<8xf32>
    %14 = vector.shape_cast %13 : vector<8xf32> to vector<8x1xf32>
    %cst_9 = arith.constant 3.125000e-02 : f32
    %15 = vector.broadcast %cst_9 : f32 to vector<8x1xf32>
    %16 = arith.mulf %14, %15 : vector<8x1xf32>
    %17 = arith.mulf %11, %11 : vector<8x1xf32>
    %18 = arith.subf %16, %17 : vector<8x1xf32>
    %cst_10 = arith.constant 0.000000e+00 : f32
    %19 = vector.broadcast %cst_10 : f32 to vector<8x1xf32>
    %20 = arith.maximumf %18, %19 : vector<8x1xf32>
    %cst_11 = arith.constant 9.99999974E-6 : f32
    %21 = vector.broadcast %cst_11 : f32 to vector<8x1xf32>
    %22 = arith.addf %20, %21 : vector<8x1xf32>
    %23 = math.rsqrt %22 : vector<8x1xf32>
    %c0_12 = arith.constant 0 : index
    %c0_13 = arith.constant 0 : index
    %24 = vector.load %arg4[%c0_12, %c0_13] : memref<1x32xf32, #tpu.memory_space<vmem>>, vector<1x32xf32>
    %25 = vector.broadcast %24 : vector<1x32xf32> to vector<8x32xf32>
    %26 = arith.mulf %7, %25 : vector<8x32xf32>
    %cst_14 = arith.constant dense<0.000000e+00> : vector<8xf32>
    %27 = vector.multi_reduction <add>, %26, %cst_14 [1] : vector<8x32xf32> to vector<8xf32>
    %28 = vector.shape_cast %27 : vector<8xf32> to vector<8x1xf32>
    %c0_15 = arith.constant 0 : index
    %c0_16 = arith.constant 0 : index
    %29 = vector.load %arg5[%c0_15, %c0_16] : memref<1x1xf32, #tpu.memory_space<vmem>>, vector<1x1xf32>
    %30 = vector.broadcast %29 : vector<1x1xf32> to vector<8x1xf32>
    %31 = arith.mulf %11, %30 : vector<8x1xf32>
    %32 = arith.subf %28, %31 : vector<8x1xf32>
    %33 = arith.mulf %23, %32 : vector<8x1xf32>
    %c0_17 = arith.constant 0 : index
    %c0_18 = arith.constant 0 : index
    %34 = vector.load %arg6[%c0_17, %c0_18] : memref<1x1xf32, #tpu.memory_space<vmem>>, vector<1x1xf32>
    %35 = vector.broadcast %34 : vector<1x1xf32> to vector<8x1xf32>
    %36 = arith.addf %33, %35 : vector<8x1xf32>
    %37 = arith.negf %36 : vector<8x1xf32>
    %38 = math.exp %37 : vector<8x1xf32>
    %cst_19 = arith.constant 1.000000e+00 : f32
    %39 = vector.broadcast %cst_19 : f32 to vector<8x1xf32>
    %40 = arith.addf %39, %38 : vector<8x1xf32>
    %41 = arith.divf %39, %40 : vector<8x1xf32>
    %c0_20 = arith.constant 0 : index
    %c0_21 = arith.constant 0 : index
    %42 = vector.load %arg7[%c0_20, %c0_21] : memref<8x1xf32, #tpu.memory_space<vmem>>, vector<8x1xf32>
    tpu.vector_store %arg7[%c0_20, %c0_21], %41 {strides = array<i32>} : memref<8x1xf32, #tpu.memory_space<vmem>>, vector<8x1xf32>,
    return
  }
  func.func @transform_0(%arg0: i32) -> (i32, i32) {
    %c0_i32 = arith.constant 0 : i32
    %c0_i32_0 = arith.constant 0 : i32
    return %arg0, %c0_i32 : i32, i32
  }
  func.func @transform_1(%arg0: i32) -> (i32, i32) {
    %c0_i32 = arith.constant 0 : i32
    %c0_i32_0 = arith.constant 0 : i32
    %c0_i32_1 = arith.constant 0 : i32
    return %c0_i32, %c0_i32_0 : i32, i32
  }
  func.func @transform_2(%arg0: i32) -> (i32, i32) {
    %c0_i32 = arith.constant 0 : i32
    %c0_i32_0 = arith.constant 0 : i32
    %c0_i32_1 = arith.constant 0 : i32
    return %c0_i32, %c0_i32_0 : i32, i32
  }
  func.func @transform_3(%arg0: i32) -> (i32, i32) {
    %c0_i32 = arith.constant 0 : i32
    %c0_i32_0 = arith.constant 0 : i32
    %c0_i32_1 = arith.constant 0 : i32
    return %c0_i32, %c0_i32_0 : i32, i32
  }
  func.func @transform_4(%arg0: i32) -> (i32, i32) {
    %c0_i32 = arith.constant 0 : i32
    %c0_i32_0 = arith.constant 0 : i32
    %c0_i32_1 = arith.constant 0 : i32
    return %c0_i32, %c0_i32_0 : i32, i32
  }
  func.func @transform_5(%arg0: i32) -> (i32, i32) {
    %c0_i32 = arith.constant 0 : i32
    %c0_i32_0 = arith.constant 0 : i32
    %c0_i32_1 = arith.constant 0 : i32
    return %c0_i32, %c0_i32_0 : i32, i32
  }
  func.func @transform_6(%arg0: i32) -> (i32, i32) {
    %c0_i32 = arith.constant 0 : i32
    %c0_i32_0 = arith.constant 0 : i32
    return %arg0, %c0_i32 : i32, i32
  }
}

</mosaic_0001>

<bundles_post_ra>
// kernel: tpu_custom_call.1
= control target key start
LH: loop header
LB: loop body
LE: loop exit
PB: predicated region body
PF: predicated region fallthrough
CT: control target
= control target key end

     0   :  { %s557_s25 = smov 0   ;;  %s611_s0 = inlined_call_operand.vmem [shape: f32[16,64], index: 0, kind: input, shape index: {}]   ;;  %s612_s1 = inlined_call_operand.vmem [shape: f32[64,32], index: 1, kind: input, shape index: {}]   ;;  %s613_s2 = inlined_call_operand.vmem [shape: f32[1,32], index: 2, kind: input, shape index: {}]   ;;  %s614_s3 = inlined_call_operand.vmem [shape: f32[1,32], index: 3, kind: input, shape index: {}]   ;;  %s615_s4 = inlined_call_operand.<no memory space> [shape: f32[1,1], index: 4, kind: input, shape index: {}]   ;;  %s616_s6 = inlined_call_operand.vmem [shape: f32[16,1], index: 6, kind: output, shape index: {}]   ;;  %s617_s5 = inlined_call_operand.<no memory space> [shape: f32[1,1], index: 5, kind: input, shape index: {}]  }
   0x1   :  { %v11_v0 = vstv %s615_s4  ;;  %v13_v1 = vstv %s617_s5 }
   0x2   :  { %12 = vst [vmem:[#allocation2] sm:$0x1] %v11_v0  ;;  %14 = vst [vmem:[#allocation3] sm:$0x1] %v13_v1 }
   0x3 LB: > { %s447_s26 = sadd.s32 4294967295, %s512_s25   ;;  %p451_p0 = scmp.ge.s32.totalorder %s512_s25, 1  ;;  %s512_s25 = sphi %s557_s25, %s20_s25  }
   0x4   : > { %p215_p1 = scmp.lt.s32.totalorder %s512_s25, 3 }
   0x6   : > { %p216_p2 = pnand %p451_p0, %p215_p1 }
   0x7   : > { %p243_p3 = scmp.lt.s32.totalorder (!%p216_p2), %s447_s26, 1 }
   0x8   : > { %219 = sbr.rel (%p216_p2) target bundleno = 429 (0x1ad), region = 44 }
   0xd   : > { %v259_v2 = vld [vmem:[%s612_s1 + $0x38] sm:$0xff]  ;;  %v514_v3 = vmov 0.0   ;;  %v258_v4 = vld [vmem:[%s612_s1 + $0x30] sm:$0xff]  ;;  %vm515_vm0 = vmmov 0   ;;  %v257_v5 = vld [vmem:[%s612_s1 + $0x28] sm:$0xff]  ;;  %s619_s26 = smov (!%p243_p3, %s447_s26), 1 }
   0xe   : > { %471 = vmatprep.subr.mxu0 %v514_v3  ;;  %487 = vmatprep.mubr.msk.f32.mxu0 %vm515_vm0, %v514_v3  ;;  %v256_v6 = vld [vmem:[%s612_s1 + $0x20] sm:$0xff]  ;;  %v255_v7 = vld [vmem:[%s612_s1 + $0x18] sm:$0xff]  ;;  %s452_s11 = sshll.u32 %s619_s26, 3  ;;  %v254_v8 = vld [vmem:[%s612_s1 + $0x10] sm:$0xff]  ;;  %vm267_vm1 = vcmask 523264   ;;  %vm342_vm2 = vcmask 261120  }
   0xf   : > { %472 = vmatpush3.msra.mxu0 %v259_v2  ;;  %v253_v9 = vld [vmem:[%s612_s1 + $0x8] sm:$0xff]  ;;  %s246_s18 = scalar_lea.vmem %s611_s0, %s452_s11  ;;  %v252_v10 = vld [vmem:[%s612_s1] sm:$0xff]  ;;  %s250_s5 = scalar_lea.vmem %s616_s6, %s452_s11  ;;  %vm392_vm3 = vcmask 7168  }
  0x10   : > { %473 = vmatprep.subr.mxu0 %v514_v3  ;;  %v251_v11 = vld [vmem:[%s246_s18] sm:$0xff] }
  0x11   : > { %474 = vmatpush3.msra.mxu0 %v258_v4  ;;  %v454_v12 = vld [vmem:[%s613_s2] ss:$0 sm:$0xff]  ;;  %v458_v36 = vld [vmem:[#allocation3] ss:$0 sm:$0xff] }
  0x12   : > { %475 = vmatprep.subr.mxu0 %v514_v3  ;;  %v456_v16 = vld [vmem:[%s614_s3] ss:$0 sm:$0xff] }
  0x13   : > { %476 = vmatpush3.msra.mxu0 %v257_v5  ;;  %v457_v31 = vld [vmem:[#allocation2] ss:$0 sm:$0xff] }
  0x14   : > { %477 = vmatprep.subr.mxu0 %v514_v3 }
  0x15   : > { %478 = vmatpush3.msra.mxu0 %v256_v6 }
  0x16   : > { %479 = vmatprep.subr.mxu0 %v514_v3 }
  0x17   : > { %480 = vmatpush3.msra.mxu0 %v255_v7 }
  0x18   : > { %481 = vmatprep.subr.mxu0 %v514_v3 }
  0x19   : > { %482 = vmatpush3.msra.mxu0 %v254_v8 }
  0x1a   : > { %483 = vmatprep.subr.mxu0 %v514_v3 }
  0x1b   : > { %484 = vmatpush3.msra.mxu0 %v253_v9 }
  0x1c   : > { %485 = vmatprep.subr.mxu0 %v514_v3 }
  0x1d   : > { %486 = vmatpush3.msra.mxu0 %v252_v10 }
  0x1e   : > { %488 = vmatmul.mubr.msk.f32.vlgmr.msra.gmra.mxu0 %vm267_vm1, %v251_v11 }
  0xde   : > { %v337_v13 = vpop.f32.mrf.mxu0 }
  0xdf   : > { %v338_v14 = vadd.f32 %v454_v12, %v337_v13 }
  0xe0   : > { %v489_v15 = vpop.f32.mrf.mxu0 }
  0xe1   : > { %v341_v17 = vmax.f32 %v338_v14, 0.0 }
  0xe3   : > { %v343_v18 = vsel %vm342_vm2, %v341_v17, 0.0  ;;  %v364_v19 = vmul.f32 %v456_v16, %v341_v17  ;;  %v347_v20 = vmul.f32 %v341_v17, %v341_v17 }
  0xe4   : > { %344 = vadd.xlane.f32.xlu0 %v343_v18 }
  0xe5   : > { %v365_v21 = vsel %vm342_vm2, %v364_v19, 0.0  ;;  %v348_v22 = vsel %vm342_vm2, %v347_v20, 0.0 }
  0xe6   : > { %366 = vadd.xlane.f32.xlu1 %v365_v21 }
  0xe8   : > { %349 = vadd.xlane.f32.xlu0 %v348_v22 }
 0x16d   : > { %v345_v23 = vpop.xlane.xlu0 %344 }
 0x16e   : > { %v346_v24 = vmul.f32 0.03125, %v345_v23 }
 0x16f   : > { %v367_v33 = vpop.xlane.xlu1 %366 }
 0x170   : > { %v352_v26 = vmul.f32 %v346_v24, %v346_v24  ;;  %v375_v32 = vmul.f32 %v457_v31, %v346_v24 }
 0x171   : > { %v350_v25 = vpop.xlane.xlu0 %349 }
 0x172   : > { %v351_v27 = vmul.f32 0.03125, %v350_v25  ;;  %v376_v34 = vsub.f32 %v367_v33, %v375_v32 }
 0x174   : > { %v353_v28 = vsub.f32 %v351_v27, %v352_v26 }
 0x176   : > { %v354_v29 = vmax.f32 %v353_v28, 0.0 }
 0x178   : > { %v355_v30 = vadd.f32 1e-05, %v354_v29 }
 0x17a   : > { %500 = vrsqrt.f32 %v355_v30 }
 0x187   : > { %v501_v35 = vpop.eup %500 }
 0x188   : > { %v377_v37 = vmul.f32 %v501_v35, %v376_v34 }
 0x18a   : > { %v385_v38 = vadd.f32 %v458_v36, %v377_v37 }
 0x18c   : > { %v459_v39 = vmul.f32 -1.442695, %v385_v38 }
 0x18e   : > { %502 = vpow2.f32 %v459_v39 }
 0x19b   : > { %v503_v40 = vpop.eup %502 }
 0x19c   : > { %v389_v41 = vadd.f32 1.0, %v503_v40 }
 0x19e   : > { %504 = vrcp.f32 %v389_v41 }
 0x1ab   : > { %v505_v42 = vpop.eup %504 }
 0x1ac   : > { %393 = vst.msk [vmem:[%s250_s5] sm:$0xff] %vm392_vm3, %v505_v42 }
 0x1ad PF: > { %s20_s25 = sadd.s32 1, %s512_s25  }
 0x1ae   : > { %p17_p4 = scmp.ge.s32.totalorder %s20_s25, 4  }
 0x1b0   :  { %19 = sbr.rel (!%p17_p4) target bundleno = 3 (0x3), region = 74 }

</bundles_post_ra>
